<compile_context>
chip_gen: v7x
topology: tpu7x:2x2x1
jax: 0.10.0
libtpu: 0.0.40
codegen_flags: <defaults>
</compile_context>

<pallas_src>
import jax
import jax.numpy as jnp
from jax.experimental import pallas as pl
from jax.experimental.pallas import tpu as pltpu

_LANE = 128
_SUBLANE = 8


def _bce_dice_partial_kernel(pred_ref, target_ref, acc_ref):
    """Grid: (NC, tiles_per_core).

    pred_ref / target_ref : (B, TR, 128) block of the flattened inputs.
    acc_ref               : (1, 4*B, 128) output block, resident across the
                            reduction axis (j); rows [0:B)=sum(p*t),
                            [B:2B)=sum(p), [2B:3B)=sum(t), [3B:4B)=sum(bce).
    """
    j = pl.program_id(1)

    @pl.when(j == 0)
    def _init():
        acc_ref[...] = jnp.zeros_like(acc_ref)

    p = pred_ref[...].astype(jnp.float32)
    t = target_ref[...].astype(jnp.float32)

    # nn.BCELoss semantics: clamp log terms at -100 (safe for p == 0 or 1,
    # and makes zero-padding contribute exactly 0).
    log_p = jnp.maximum(jnp.log(p), -100.0)
    log_1mp = jnp.maximum(jnp.log(1.0 - p), -100.0)
    bce_elem = -(t * log_p + (1.0 - t) * log_1mp)

    # Reduce only the sublane (TR) axis -> lane-dense (B, 128) partials.
    inter = jnp.sum(p * t, axis=1)
    psum = jnp.sum(p, axis=1)
    tsum = jnp.sum(t, axis=1)
    bsum = jnp.sum(bce_elem, axis=1)

    partial = jnp.concatenate([inter, psum, tsum, bsum], axis=0)  # (4*B, 128)
    acc_ref[...] += partial[None]


def bce_dice_loss(pred, target, wb=1.0, wd=1.0):
    """pred, target: (B, ...) arrays; pred must be a probability in (0, 1)."""
    B = pred.shape[0]
    pred2 = pred.reshape(B, -1)      # native dtype, no upcast (halves HBM traffic
    target2 = target.reshape(B, -1)  # for bf16 inputs; cast to f32 in-VMEM)
    N = pred2.shape[1]

    itemsize = max(
        jnp.dtype(pred2.dtype).itemsize, jnp.dtype(target2.dtype).itemsize
    )
    # Sublane granularity that matches native tiling for packed dtypes.
    sub = _SUBLANE * max(1, 4 // itemsize)

    # Rows of 128 lanes.
    R = pl.cdiv(N, _LANE)

    # TR: ~1 MiB per input block (2 inputs x 2 pipeline buffers ~ 4 MiB, safe
    # even under v5e's 16 MiB scoped-VMEM default, and wide enough to sit at
    # the HBM roofline on v6e/v7x).
    target_block_bytes = 1 << 20
    tr_cap = max(sub, (target_block_bytes // (B * _LANE * itemsize)) // sub * sub)
    TR = min(tr_cap, pl.cdiv(R, sub) * sub)

    num_blocks = pl.cdiv(R, TR)
    NC = 2 if num_blocks >= 2 else 1          # 2-way core split (wins on v7x)
    num_blocks = pl.cdiv(num_blocks, NC) * NC
    tiles_per_core = num_blocks // NC
    R_pad = num_blocks * TR
    N_pad = R_pad * _LANE

    def _prep(x):
        if N_pad != N:
            x = jnp.pad(x, ((0, 0), (0, N_pad - N)))  # zeros contribute 0 to all sums
        return x.reshape(B, R_pad, _LANE)

    p3 = _prep(pred2)
    t3 = _prep(target2)

    def row_map(c, j):
        return (0, c * tiles_per_core + j, 0)

    partials = pl.pallas_call(
        _bce_dice_partial_kernel,
        out_shape=jax.ShapeDtypeStruct((NC, 4 * B, _LANE), jnp.float32),
        grid_spec=pltpu.PrefetchScalarGridSpec(
            num_scalar_prefetch=0,
            grid=(NC, tiles_per_core),
            in_specs=[
                pl.BlockSpec((B, TR, _LANE), row_map),
                pl.BlockSpec((B, TR, _LANE), row_map),
            ],
            out_specs=pl.BlockSpec((1, 4 * B, _LANE), lambda c, j: (c, 0, 0)),
        ),
        compiler_params=pltpu.CompilerParams(
            dimension_semantics=("parallel", "arbitrary"),
        ),
    )(p3, t3)

    # Tiny JAX epilogue: combine per-core partials, collapse lanes, finish loss.
    sums = jnp.sum(partials, axis=(0, 2)).reshape(4, B)   # (4, B)
    inter, psum, tsum, bsum = sums[0], sums[1], sums[2], sums[3]

    smooth = 1.0
    dice_score = (2.0 * inter + smooth) / (psum + tsum + smooth)   # (B,)
    dice_loss = 1.0 - jnp.sum(dice_score) / B
    bce_mean = jnp.sum(bsum) / (B * N)                     # divide by ORIGINAL N
    return wd * dice_loss + wb * bce_mean


def _reference_loss(pred, target, wb=1.0, wd=1.0):
    """Pure-JAX reference mirroring the PyTorch module."""
    B = pred.shape[0]
    p = pred.reshape(B, -1).astype(jnp.float32)
    t = target.reshape(B, -1).astype(jnp.float32)
    log_p = jnp.maximum(jnp.log(p), -100.0)
    log_1mp = jnp.maximum(jnp.log(1.0 - p), -100.0)
    bce = jnp.mean(-(t * log_p + (1.0 - t) * log_1mp))
    smooth = 1.0
    inter = jnp.sum(p * t, axis=1)
    dice_score = (2.0 * inter + smooth) / (
        jnp.sum(p, axis=1) + jnp.sum(t, axis=1) + smooth
    )
    dice = 1.0 - jnp.sum(dice_score) / B
    return wd * dice + wb * bce


if __name__ == "__main__":
    key = jax.random.PRNGKey(0)
    k1, k2 = jax.random.split(key)

    B, C, H, W = 2, 4, 16, 16
    # pred must be a probability (PyTorch nn.BCELoss expects inputs in (0,1)).
    pred = jax.nn.sigmoid(jax.random.normal(k1, (B, C, H, W), dtype=jnp.float32))
    target = (jax.random.uniform(k2, (B, C, H, W)) > 0.5).astype(jnp.float32)

    loss = bce_dice_loss(pred, target, wb=1.0, wd=1.0)
    loss = jax.block_until_ready(loss)

    ref = _reference_loss(pred, target, wb=1.0, wd=1.0)
    assert jnp.allclose(loss, ref, rtol=1e-5, atol=1e-5), (loss, ref)

    print("KERNEL_OK")
</pallas_src>

<mosaic_0001>
module attributes {stable_mosaic.version = 11 : i64} {
  func.func @_bce_dice_partial_kernel(%arg0: i32, %arg1: i32, %arg2: memref<2x8x128xf32, #tpu.memory_space<vmem>>, %arg3: memref<2x8x128xf32, #tpu.memory_space<vmem>>, %arg4: memref<1x8x128xf32, #tpu.memory_space<vmem>>) attributes {dimension_semantics = [#tpu.dimension_semantics<parallel>, #tpu.dimension_semantics<arbitrary>], iteration_bounds = array<i64: 1, 1>, scalar_prefetch = 0 : i64, scratch_operands = 0 : i64, tpu.core_type = #tpu.core_type<tc>, window_params = [{transform_indices = @transform_0, window_bounds = array<i64: 2, 8, 128>}, {transform_indices = @transform_1, window_bounds = array<i64: 2, 8, 128>}, {transform_indices = @transform_2, window_bounds = array<i64: 1, 8, 128>}]} {
    %c0_i32 = arith.constant 0 : i32
    %0 = arith.cmpi eq, %arg1, %c0_i32 : i32
    %1 = arith.extui %0 : i1 to i32
    %c0_i32_0 = arith.constant 0 : i32
    %2 = arith.cmpi ne, %1, %c0_i32_0 : i32
    scf.if %2 {
      %cst_20 = arith.constant 0.000000e+00 : f32
      %30 = vector.broadcast %cst_20 : f32 to vector<1x8x128xf32>
      %c0_21 = arith.constant 0 : index
      %c0_22 = arith.constant 0 : index
      %c0_23 = arith.constant 0 : index
      %31 = vector.load %arg4[%c0_21, %c0_22, %c0_23] : memref<1x8x128xf32, #tpu.memory_space<vmem>>, vector<1x8x128xf32>
      tpu.vector_store %arg4[%c0_21, %c0_22, %c0_23], %30 {strides = array<i32>} : memref<1x8x128xf32, #tpu.memory_space<vmem>>, vector<1x8x128xf32>,
    } else {
    }
    %c0 = arith.constant 0 : index
    %c0_1 = arith.constant 0 : index
    %c0_2 = arith.constant 0 : index
    %3 = vector.load %arg2[%c0, %c0_1, %c0_2] : memref<2x8x128xf32, #tpu.memory_space<vmem>>, vector<2x8x128xf32>
    %c0_3 = arith.constant 0 : index
    %c0_4 = arith.constant 0 : index
    %c0_5 = arith.constant 0 : index
    %4 = vector.load %arg3[%c0_3, %c0_4, %c0_5] : memref<2x8x128xf32, #tpu.memory_space<vmem>>, vector<2x8x128xf32>
    %5 = math.log %3 : vector<2x8x128xf32>
    %cst = arith.constant -1.000000e+02 : f32
    %6 = vector.broadcast %cst : f32 to vector<2x8x128xf32>
    %7 = arith.maximumf %5, %6 : vector<2x8x128xf32>
    %cst_6 = arith.constant 1.000000e+00 : f32
    %8 = vector.broadcast %cst_6 : f32 to vector<2x8x128xf32>
    %9 = arith.subf %8, %3 : vector<2x8x128xf32>
    %10 = math.log %9 : vector<2x8x128xf32>
    %cst_7 = arith.constant -1.000000e+02 : f32
    %11 = vector.broadcast %cst_7 : f32 to vector<2x8x128xf32>
    %12 = arith.maximumf %10, %11 : vector<2x8x128xf32>
    %13 = arith.mulf %4, %7 : vector<2x8x128xf32>
    %cst_8 = arith.constant 1.000000e+00 : f32
    %14 = vector.broadcast %cst_8 : f32 to vector<2x8x128xf32>
    %15 = arith.subf %14, %4 : vector<2x8x128xf32>
    %16 = arith.mulf %15, %12 : vector<2x8x128xf32>
    %17 = arith.addf %13, %16 : vector<2x8x128xf32>
    %cst_9 = arith.constant 0.000000e+00 : f32
    %18 = vector.broadcast %cst_9 : f32 to vector<2x8x128xf32>
    %19 = arith.subf %18, %17 : vector<2x8x128xf32>
    %20 = arith.mulf %3, %4 : vector<2x8x128xf32>
    %cst_10 = arith.constant dense<0.000000e+00> : vector<2x128xf32>
    %21 = vector.multi_reduction <add>, %20, %cst_10 [1] : vector<2x8x128xf32> to vector<2x128xf32>
    %cst_11 = arith.constant dense<0.000000e+00> : vector<2x128xf32>
    %22 = vector.multi_reduction <add>, %3, %cst_11 [1] : vector<2x8x128xf32> to vector<2x128xf32>
    %cst_12 = arith.constant dense<0.000000e+00> : vector<2x128xf32>
    %23 = vector.multi_reduction <add>, %4, %cst_12 [1] : vector<2x8x128xf32> to vector<2x128xf32>
    %cst_13 = arith.constant dense<0.000000e+00> : vector<2x128xf32>
    %24 = vector.multi_reduction <add>, %19, %cst_13 [1] : vector<2x8x128xf32> to vector<2x128xf32>
    %25 = tpu.concatenate %21, %22, %23, %24 in 0 : vector<2x128xf32>, vector<2x128xf32>, vector<2x128xf32>, vector<2x128xf32> -> vector<8x128xf32>
    %c0_14 = arith.constant 0 : index
    %c0_15 = arith.constant 0 : index
    %c0_16 = arith.constant 0 : index
    %26 = vector.load %arg4[%c0_14, %c0_15, %c0_16] : memref<1x8x128xf32, #tpu.memory_space<vmem>>, vector<1x8x128xf32>
    %27 = vector.shape_cast %25 : vector<8x128xf32> to vector<1x8x128xf32>
    %28 = arith.addf %26, %27 : vector<1x8x128xf32>
    %c0_17 = arith.constant 0 : index
    %c0_18 = arith.constant 0 : index
    %c0_19 = arith.constant 0 : index
    %29 = vector.load %arg4[%c0_17, %c0_18, %c0_19] : memref<1x8x128xf32, #tpu.memory_space<vmem>>, vector<1x8x128xf32>
    tpu.vector_store %arg4[%c0_17, %c0_18, %c0_19], %28 {strides = array<i32>} : memref<1x8x128xf32, #tpu.memory_space<vmem>>, vector<1x8x128xf32>,
    return
  }
  func.func @transform_0(%arg0: i32, %arg1: i32) -> (i32, i32, i32) {
    %c1_i32 = arith.constant 1 : i32
    %0 = arith.muli %arg0, %c1_i32 : i32
    %1 = arith.addi %0, %arg1 : i32
    %c0_i32 = arith.constant 0 : i32
    %c0_i32_0 = arith.constant 0 : i32
    %c0_i32_1 = arith.constant 0 : i32
    return %c0_i32, %1, %c0_i32_0 : i32, i32, i32
  }
  func.func @transform_1(%arg0: i32, %arg1: i32) -> (i32, i32, i32) {
    %c1_i32 = arith.constant 1 : i32
    %0 = arith.muli %arg0, %c1_i32 : i32
    %1 = arith.addi %0, %arg1 : i32
    %c0_i32 = arith.constant 0 : i32
    %c0_i32_0 = arith.constant 0 : i32
    %c0_i32_1 = arith.constant 0 : i32
    return %c0_i32, %1, %c0_i32_0 : i32, i32, i32
  }
  func.func @transform_2(%arg0: i32, %arg1: i32) -> (i32, i32, i32) {
    %c0_i32 = arith.constant 0 : i32
    %c0_i32_0 = arith.constant 0 : i32
    %c0_i32_1 = arith.constant 0 : i32
    return %arg0, %c0_i32, %c0_i32_0 : i32, i32, i32
  }
}

</mosaic_0001>

<bundles_post_ra>
// kernel: tpu_custom_call.1
= control target key start
LH: loop header
LB: loop body
LE: loop exit
PB: predicated region body
PF: predicated region fallthrough
CT: control target
= control target key end

     0   :  { %7 = vsyncpa [#allocation3], 0  ;;  %s318_s0 = inlined_call_operand.hbm [shape: f32[2,8,128], index: 0, kind: input, shape index: {}]   ;;  %s319_s1 = inlined_call_operand.hbm [shape: f32[2,8,128], index: 1, kind: input, shape index: {}]   ;;  %s320_s2 = inlined_call_operand.hbm [shape: f32[1,8,128], index: 2, kind: output, shape index: {}]  }
   0x1   :  { %8 = vsyncpa [#allocation6], 0 }
   0x2   :  { %9 = vsyncpa [#allocation4], 0  ;;  %s262_s9 = smov [#allocation2]   ;;  %s190_s13 = scalar_lea.hbm %s318_s0, 256 }
   0x3   :  { %s18_s10 = sshll.u32 %s262_s9, 4  ;;  %p191_p0 = scmp.ne.s32.totalorder %s318_s0, %s190_s13  ;;  %s19_s10 = int_to_ptr.vmem [resolvable:$true] %s18_s10 }
   0x4   :  { %p194_p1 = scmp.lt.u32.totalorder %s190_s13, %s318_s0 }
   0x6   :  { %p196_p2 = pnand %p194_p1, %p191_p0 }
   0x8   :  { %199 = shalt.err (!%p196_p2)
}
   0x9   :  { %s200_s18 = scalar_lea.vmem %s19_s10, 256  ;;  %p205_p4 = scmp.lt.s32.totalorder %s19_s10, %s19_s10 }
   0xa   :  { %p201_p3 = scmp.ne.s32.totalorder %s19_s10, %s200_s18  ;;  %p206_p5 = scmp.lt.s32.totalorder %s200_s18, %s200_s18 }
   0xc   :  { %p207_p6 = por %p206_p5, %p205_p4 }
   0xe   :  { %p208_p7 = pnand %p207_p6, %p201_p3 }
  0x10   :  { %211 = shalt.err (!%p208_p7)
}
  0x11   :  { %s263_s19 = smov 128   ;;  %s264_s20 = smov 8  }
  0x12   :  { %24 = dma.hbm_to_vmem [thread:$0]  %s318_s0, 256, %s19_s10, [#allocation3], %s263_s19, %s263_s19, %s264_s20  }
  0x13   :  { %s265_s23 = smov [#allocation5]   ;;  %s212_s27 = scalar_lea.hbm %s319_s1, 256 }
  0x14   :  { %s33_s24 = sshll.u32 %s265_s23, 4  ;;  %p213_p8 = scmp.ne.s32.totalorder %s319_s1, %s212_s27  ;;  %s34_s24 = int_to_ptr.vmem [resolvable:$true] %s33_s24 }
  0x15   :  { %p216_p9 = scmp.lt.u32.totalorder %s212_s27, %s319_s1 }
  0x17   :  { %p218_p10 = pnand %p216_p9, %p213_p8 }
  0x19   :  { %221 = shalt.err (!%p218_p10)
}
  0x1a   :  { %s222_s4 = scalar_lea.vmem %s34_s24, 256  ;;  %p227_p12 = scmp.lt.s32.totalorder %s34_s24, %s34_s24 }
  0x1b   :  { %p223_p11 = scmp.ne.s32.totalorder %s34_s24, %s222_s4  ;;  %p228_p13 = scmp.lt.s32.totalorder %s222_s4, %s222_s4 }
  0x1d   :  { %p229_p0 = por %p228_p13, %p227_p12 }
  0x1f   :  { %p230_p1 = pnand %p229_p0, %p223_p11 }
  0x21   :  { %233 = shalt.err (!%p230_p1)
}
  0x22   :  { %39 = dma.hbm_to_vmem [thread:$0]  %s319_s1, 256, %s34_s24, [#allocation6], %s263_s19, %s263_s19, %s264_s20  }
  0x23   :  { %256 = dma.done.wait [#allocation3], 256  }
  0x24   :  { %257 = vsyncadd [#allocation3], 4294967040 }
  0x25   :  { %258 = dma.done.wait [#allocation6], 256  }
  0x26   :  { %259 = vsyncadd [#allocation6], 4294967040  ;;  %v53_v0 = vld [vmem:[#allocation2] sm:$0xff]  ;;  %v54_v1 = vld [vmem:[#allocation2 + $0x8] sm:$0xff]  ;;  %vm133_vm0 = vcmask 1041409   ;;  %vm138_vm1 = vcmask 1043459  }
  0x27   :  { %v55_v2 = vld [vmem:[#allocation5] sm:$0xff]  ;;  %v56_v3 = vld [vmem:[#allocation5 + $0x8] sm:$0xff]  ;;  %182 = vlog2.f32 %v53_v0  ;;  %v63_v4 = vsub.f32 1.0, %v53_v0  ;;  %v64_v5 = vsub.f32 1.0, %v54_v1  ;;  %v95_v8 = vrot.slane %v53_v0, 4  ;;  %s266_s1 = smov [#allocation7]  }
  0x28   :  { %184 = vlog2.f32 %v54_v1  ;;  %v81_v6 = vmul.f32 %v55_v2, %v53_v0  ;;  %v82_v7 = vmul.f32 %v56_v3, %v54_v1  ;;  %v101_v9 = vrot.slane %v54_v1, 4  ;;  %s166_s6 = sshll.u32 %s266_s1, 4  ;;  %s167_s6 = int_to_ptr.vmem [resolvable:$true] %s166_s6 }
  0x29   :  { %186 = vlog2.f32 %v63_v4  ;;  %v107_v12 = vrot.slane %v55_v2, 4  ;;  %v113_v13 = vrot.slane %v56_v3, 4  ;;  %v96_v14 = vadd.f32 %v95_v8, %v53_v0  ;;  %s234_s7 = scalar_lea.vmem %s167_s6, 128  ;;  %p239_p3 = scmp.lt.s32.totalorder %s167_s6, %s167_s6 }
  0x2a   :  { %188 = vlog2.f32 %v64_v5  ;;  %v83_v10 = vrot.slane %v81_v6, 4  ;;  %v89_v11 = vrot.slane %v82_v7, 4  ;;  %v102_v15 = vadd.f32 %v101_v9, %v54_v1  ;;  %p235_p2 = scmp.ne.s32.totalorder %s167_s6, %s234_s7  ;;  %p240_p4 = scmp.lt.s32.totalorder %s234_s7, %s234_s7 }
  0x2b   :  { %v108_v19 = vadd.f32 %v107_v12, %v55_v2  ;;  %v114_v20 = vadd.f32 %v113_v13, %v56_v3  ;;  %v97_v23 = vrot.slane %v96_v14, 2  ;;  %v73_v32 = vsub.f32 1.0, %v55_v2 }
  0x2c   :  { %v84_v16 = vadd.f32 %v83_v10, %v81_v6  ;;  %v90_v17 = vadd.f32 %v89_v11, %v82_v7  ;;  %v103_v24 = vrot.slane %v102_v15, 2  ;;  %v74_v33 = vsub.f32 1.0, %v56_v3  ;;  %p241_p5 = por %p240_p4, %p239_p3 }
  0x2d   :  { %v109_v36 = vrot.slane %v108_v19, 2  ;;  %v115_v37 = vrot.slane %v114_v20, 2  ;;  %v98_v40 = vadd.f32 %v97_v23, %v96_v14  ;;  %vm143_vm2 = vcmask 1045509  }
  0x2e   :  { %v85_v27 = vrot.slane %v84_v16, 2  ;;  %v91_v28 = vrot.slane %v90_v17, 2  ;;  %v104_v41 = vadd.f32 %v103_v24, %v102_v15  ;;  %vm151_vm3 = vcmask 1041408   ;;  %p242_p6 = pnand %p241_p5, %p235_p2 }
  0x2f   :  { %v99_v49 = vrot.slane %v98_v40, 1  ;;  %v110_v50 = vadd.f32 %v109_v36, %v108_v19  ;;  %v116_v51 = vadd.f32 %v115_v37, %v114_v20  ;;  %vm153_vm4 = vcmask 1043456  }
  0x30   :  { %v86_v44 = vadd.f32 %v85_v27, %v84_v16  ;;  %v92_v45 = vadd.f32 %v91_v28, %v90_v17  ;;  %v105_v55 = vrot.slane %v104_v41, 1  ;;  %vm148_vm5 = vcmask 1047559  }
  0x31   :  { %v183_v18 = vpop.eup %182  ;;  %v100_v58 = vadd.f32 %v99_v49, %v98_v40  ;;  %v111_v59 = vrot.slane %v110_v50, 1  ;;  %v117_v60 = vrot.slane %v116_v51, 1  ;;  %vm155_vm6 = vcmask 1045504  }
  0x32   :  { %v185_v21 = vpop.eup %184  ;;  %v58_v22 = vmul.f32 0.6931472, %v183_v18  ;;  %v87_v53 = vrot.slane %v86_v44, 1  ;;  %v93_v54 = vrot.slane %v92_v45, 1  ;;  %v106_v0 = vadd.f32 %v105_v55, %v104_v41 }
  0x33   :  { %v187_v25 = vpop.eup %186  ;;  %v60_v26 = vmul.f32 0.6931472, %v185_v21  ;;  %v112_v4 = vadd.f32 %v111_v59, %v110_v50  ;;  %v118_v5 = vadd.f32 %v117_v60, %v116_v51 }
  0x34   :  { %v189_v29 = vpop.eup %188  ;;  %v61_v30 = vmax.f32 %v58_v22, -100.0  ;;  %v66_v31 = vmul.f32 0.6931472, %v187_v25  ;;  %v88_v62 = vadd.f32 %v87_v53, %v86_v44  ;;  %v94_v63 = vadd.f32 %v93_v54, %v92_v45 }
  0x35   :  { %v62_v34 = vmax.f32 %v60_v26, -100.0  ;;  %v68_v35 = vmul.f32 0.6931472, %v189_v29  ;;  %v139_v9 = vsel %vm138_vm1, %v106_v0, %v100_v58  ;;  %v144_v13 = vsel %vm143_vm2, %v118_v5, %v112_v4 }
  0x36   :  { %v69_v38 = vmax.f32 %v66_v31, -100.0  ;;  %v71_v39 = vmul.f32 %v61_v30, %v55_v2  ;;  %v134_v8 = vsel %vm133_vm0, %v94_v63, %v88_v62 }
  0x37   :  { %v70_v42 = vmax.f32 %v68_v35, -100.0  ;;  %v72_v43 = vmul.f32 %v62_v34, %v56_v3  ;;  %v152_v14 = vsel %vm151_vm3, %v134_v8, %v139_v9 }
  0x38   :  { %v75_v46 = vmul.f32 %v73_v32, %v69_v38  ;;  %v154_v18 = vsel %vm153_vm4, %v152_v14, %v144_v13 }
  0x39   :  { %v76_v47 = vmul.f32 %v74_v33, %v70_v42 }
  0x3a   :  { %v77_v48 = vadd.f32 %v75_v46, %v71_v39 }
  0x3b   :  { %v78_v52 = vadd.f32 %v76_v47, %v72_v43 }
  0x3c   :  { %v79_v56 = vsub.f32 0.0, %v77_v48 }
  0x3d   :  { %v80_v57 = vsub.f32 0.0, %v78_v52 }
  0x3e   :  { %v119_v61 = vrot.slane %v79_v56, 4 }
  0x3f   :  { %v125_v1 = vrot.slane %v80_v57, 4 }
  0x40   :  { %v120_v2 = vadd.f32 %v119_v61, %v79_v56 }
  0x41   :  { %v126_v3 = vadd.f32 %v125_v1, %v80_v57 }
  0x42   :  { %v121_v6 = vrot.slane %v120_v2, 2 }
  0x43   :  { %v127_v7 = vrot.slane %v126_v3, 2 }
  0x44   :  { %v122_v10 = vadd.f32 %v121_v6, %v120_v2 }
  0x45   :  { %v128_v11 = vadd.f32 %v127_v7, %v126_v3 }
  0x46   :  { %v123_v12 = vrot.slane %v122_v10, 1 }
  0x47   :  { %v129_v15 = vrot.slane %v128_v11, 1 }
  0x48   :  { %v124_v16 = vadd.f32 %v123_v12, %v122_v10 }
  0x49   :  { %v130_v17 = vadd.f32 %v129_v15, %v128_v11 }
  0x4b   :  { %v149_v19 = vsel %vm148_vm5, %v130_v17, %v124_v16 }
  0x4c   :  { %v156_v20 = vsel %vm155_vm6, %v154_v18, %v149_v19 }
  0x4d   :  { %159 = vst [vmem:[#allocation7] sm:$0xff] %v156_v20 }
  0x4e   :  { %245 = shalt.err (!%p242_p6)
}
  0x4f   :  { %s246_s10 = scalar_lea.hbm %s320_s2, 128 }
  0x50   :  { %p247_p7 = scmp.ne.s32.totalorder %s320_s2, %s246_s10  ;;  %p250_p8 = scmp.lt.u32.totalorder %s246_s10, %s320_s2 }
  0x52   :  { %p252_p9 = pnand %p250_p8, %p247_p7 }
  0x54   :  { %255 = shalt.err (!%p252_p9)
}
  0x55   :  { %169 = dma.vmem_to_hbm [thread:$0]  %s167_s6, 128, %s320_s2, [#allocation4]  }
  0x56   :  { %260 = dma.done.wait [#allocation4], 128  }
  0x57   :  { %261 = vsyncadd [#allocation4], 4294967168 }
  0x58   :  { %173 = vsyncpa [#allocation3], 1 }
  0x59   :  { %174 = vsyncpa [#allocation6], 1 }
  0x5a   :  { %175 = vsyncpa [#allocation4], 1 }

</bundles_post_ra>
